<compile_context>
chip_gen: v7x
topology: tpu7x:2x2x1
jax: 0.10.0
libtpu: 0.0.40
codegen_flags: <defaults>
</compile_context>

<pallas_src>
from functools import partial

import jax
import jax.numpy as jnp
from jax.experimental import pallas as pl
from jax.experimental.pallas import tpu as pltpu

# ---- tuning constants -------------------------------------------------------
_L_CANDIDATES = (1024, 512, 256, 128)   # lane widths (multiples of 128)
_BLOCK_ELEMS = 512 * 1024               # elements per grid-step block (2 MiB f32)
_SMALL_ELEMS = _BLOCK_ELEMS             # single-block threshold (lane-aligned)
_SMALL_UNALIGNED = 64 * 1024            # single-block threshold, (1, n) layout
_NUM_CORES = 2                          # leading "parallel" axis (v7x megacore)
_VMEM_LIMIT = 32 * 1024 * 1024          # explicit headroom (raises v5e's 16 MiB)


def _bce_terms(p_raw, t_raw):
    """Un-negated BCE contribution: t*log(p) + (1-t)*log(1-p), after clamping."""
    p = jnp.clip(p_raw.astype(jnp.float32), 1e-6, 1.0 - 1e-6)
    t = t_raw.astype(jnp.float32)
    l1 = jnp.log(1.0 - p)
    # re-associated form: l1 + t*(log(p) - l1)  (saves a sub+mul per element)
    return l1 + t * (jnp.log(p) - l1)


# ---- kernels ----------------------------------------------------------------
def _bce_single_kernel(p_ref, t_ref, o_ref):
    """Whole array in one VMEM block -> scalar sum in SMEM."""
    o_ref[0, 0] = jnp.sum(_bce_terms(p_ref[...], t_ref[...]))


def _bce_tiled_kernel(p_ref, t_ref, o_ref, *, R, L, NB, rows, ragged):
    """Streaming reduction into a per-core (8, L) resident accumulator."""
    i = pl.program_id(1)  # reduction ("arbitrary") axis within this core's range

    @pl.when(i == 0)
    def _():
        o_ref[...] = jnp.zeros_like(o_ref)

    s = _bce_terms(p_ref[...], t_ref[...])          # (R, L) f32

    def fold(x):
        # (R, L) -> (R//8, 8, L) is a free, tile-aligned reshape; the axis-0 sum
        # is pure VPU vreg adds into an (8, L) slab (no XLU, no big acc traffic).
        return jnp.sum(x.reshape(R // 8, 8, L), axis=0)

    if not ragged:
        o_ref[...] += fold(s)
    else:
        g = pl.program_id(0) * NB + i               # global (un-clamped) block id
        valid = rows - g * R                        # real rows in this block

        @pl.when(valid >= R)                        # common case: full block
        def _():
            o_ref[...] += fold(s)

        @pl.when(valid < R)                         # boundary / empty block only
        def _():
            row_ids = jax.lax.broadcasted_iota(jnp.int32, (R, L), 0)
            o_ref[...] += fold(jnp.where(row_ids < valid, s, 0.0))


# ---- pallas_call wrappers ---------------------------------------------------
def _bce_sum_single(p2, t2):
    out = pl.pallas_call(
        _bce_single_kernel,
        out_shape=jax.ShapeDtypeStruct((1, 1), jnp.float32),
        in_specs=[pl.BlockSpec(memory_space=pltpu.MemorySpace.VMEM),
                  pl.BlockSpec(memory_space=pltpu.MemorySpace.VMEM)],
        out_specs=pl.BlockSpec(memory_space=pltpu.MemorySpace.SMEM),
        compiler_params=pltpu.CompilerParams(vmem_limit_bytes=_VMEM_LIMIT),
    )(p2, t2)
    return out[0, 0]


def _bce_sum_tiled(p2, t2):
    rows, L = p2.shape
    R = _BLOCK_ELEMS // L                           # 512..4096, multiple of 16
    nb_total = -(-rows // R)
    C = min(_NUM_CORES, nb_total)
    NB = -(-nb_total // C)
    ragged = (rows % R != 0) or (C * NB != nb_total)
    last = nb_total - 1

    if ragged:
        # Clamp so the boundary/empty block's DMA stays in bounds; the extra
        # (re-read) rows are masked to zero inside the kernel.
        def idx(c, i):
            return (jnp.minimum(c * NB + i, last), 0)
    else:
        def idx(c, i):
            return (c * NB + i, 0)

    kernel = partial(_bce_tiled_kernel, R=R, L=L, NB=NB, rows=rows, ragged=ragged)
    partials = pl.pallas_call(
        kernel,
        out_shape=jax.ShapeDtypeStruct((C * 8, L), jnp.float32),
        grid_spec=pltpu.PrefetchScalarGridSpec(
            num_scalar_prefetch=0,
            grid=(C, NB),
            in_specs=[pl.BlockSpec((R, L), idx),
                      pl.BlockSpec((R, L), idx)],
            # One small resident accumulator block per core (constant over the
            # reduction axis, distinct block per parallel core index).
            out_specs=pl.BlockSpec((8, L), lambda c, i: (c, 0)),
        ),
        compiler_params=pltpu.CompilerParams(
            dimension_semantics=("parallel", "arbitrary"),
            vmem_limit_bytes=_VMEM_LIMIT),
    )(p2, t2)
    return jnp.sum(partials)                        # <= 64 KiB final reduce


# ---- public entry point -----------------------------------------------------
def binary_cross_entropy_loss(predict, target):
    assert predict.shape[0] == target.shape[0], \
        "predict & target batch size don't match"

    numel = int(target.size)
    p = predict.reshape(-1)                         # free (contiguous) reshape
    t = target.reshape(-1)

    total = jnp.float32(0.0)
    n = numel
    if n % 128 != 0 and n > _SMALL_UNALIGNED:
        # Rare edge case: large tensor whose size is not lane-aligned.  Fold the
        # sub-128 tail with a tiny jnp epilogue; the prefix slice is the only
        # remaining wrapper-side copy and only triggers here.
        cut = (n // 128) * 128
        total = total + jnp.sum(_bce_terms(p[cut:], t[cut:]))
        p, t, n = p[:cut], t[:cut], cut

    if n % 128 == 0:
        L = next(c for c in _L_CANDIDATES if n % c == 0)
        p2, t2 = p.reshape(n // L, L), t.reshape(n // L, L)   # free reshapes
    else:
        p2, t2 = p.reshape(1, n), t.reshape(1, n)             # small & unaligned

    if n % 128 != 0 or n <= _SMALL_ELEMS:
        total = total + _bce_sum_single(p2, t2)
    else:
        total = total + _bce_sum_tiled(p2, t2)

    return -total / numel


# ---- self test --------------------------------------------------------------
if __name__ == "__main__":
    key = jax.random.PRNGKey(0)
    k1, k2, k3, k4 = jax.random.split(key, 4)

    def ref_loss(predict, target):
        pr = jnp.clip(predict, 1e-6, 1 - 1e-6).reshape(predict.shape[0], -1)
        tr = target.reshape(target.shape[0], -1).astype(jnp.float32)
        return jnp.sum(-(tr * jnp.log(pr) + (1 - tr) * jnp.log(1 - pr))) / tr.size

    # 1) Small NCHW input (module-scale test) -> single-block fast path.
    B, C, H, W = 2, 4, 16, 16
    predict = jax.random.uniform(k1, (B, C, H, W), jnp.float32, 0.0, 1.0)
    target = (jax.random.uniform(k2, (B, C, H, W)) > 0.5).astype(jnp.float32)
    out = binary_cross_entropy_loss(predict, target)
    jax.block_until_ready(out)
    assert jnp.allclose(out, ref_loss(predict, target), rtol=1e-4, atol=1e-6), \
        (out, ref_loss(predict, target))

    # 2) Larger input -> tiled streaming path, even 2-way block split.
    p2 = jax.random.uniform(k3, (2, 4, 512, 256), jnp.float32, 0.0, 1.0)
    t2 = (jax.random.uniform(k4, (2, 4, 512, 256)) > 0.5).astype(jnp.float32)
    out2 = binary_cross_entropy_loss(p2, t2)
    jax.block_until_ready(out2)
    assert jnp.allclose(out2, ref_loss(p2, t2), rtol=1e-4, atol=1e-6), \
        (out2, ref_loss(p2, t2))

    # 3) Ragged block count (exercises the gated boundary mask + empty block),
    #    with soft (non-binary) targets.
    p3 = jax.random.uniform(k1, (2, 5, 512, 256), jnp.float32, 0.0, 1.0)
    t3 = jax.random.uniform(k2, (2, 5, 512, 256), jnp.float32)
    out3 = binary_cross_entropy_loss(p3, t3)
    jax.block_until_ready(out3)
    assert jnp.allclose(out3, ref_loss(p3, t3), rtol=1e-4, atol=1e-6), \
        (out3, ref_loss(p3, t3))

    print("KERNEL_OK")
</pallas_src>

<mosaic_0001>
module attributes {stable_mosaic.version = 11 : i64} {
  func.func @_bce_single_kernel(%arg0: memref<2x1024xf32, #tpu.memory_space<vmem>>, %arg1: memref<2x1024xf32, #tpu.memory_space<vmem>>, %arg2: memref<1x1xf32, #tpu.memory_space<smem>>) attributes {dimension_semantics = [], scalar_prefetch = 0 : i64, scratch_operands = 0 : i64, tpu.core_type = #tpu.core_type<tc>} {
    %c0 = arith.constant 0 : index
    %c0_0 = arith.constant 0 : index
    %0 = vector.load %arg0[%c0, %c0_0] : memref<2x1024xf32, #tpu.memory_space<vmem>>, vector<2x1024xf32>
    %c0_1 = arith.constant 0 : index
    %c0_2 = arith.constant 0 : index
    %1 = vector.load %arg1[%c0_1, %c0_2] : memref<2x1024xf32, #tpu.memory_space<vmem>>, vector<2x1024xf32>
    %cst = arith.constant 9.99999997E-7 : f32
    %cst_3 = arith.constant 0.999998986 : f32
    %2 = vector.broadcast %cst : f32 to vector<2x1024xf32>
    %3 = arith.maximumf %2, %0 : vector<2x1024xf32>
    %4 = vector.broadcast %cst_3 : f32 to vector<2x1024xf32>
    %5 = arith.minimumf %4, %3 : vector<2x1024xf32>
    %cst_4 = arith.constant 1.000000e+00 : f32
    %6 = vector.broadcast %cst_4 : f32 to vector<2x1024xf32>
    %7 = arith.subf %6, %5 : vector<2x1024xf32>
    %8 = math.log %7 : vector<2x1024xf32>
    %9 = math.log %5 : vector<2x1024xf32>
    %10 = arith.subf %9, %8 : vector<2x1024xf32>
    %11 = arith.mulf %1, %10 : vector<2x1024xf32>
    %12 = arith.addf %8, %11 : vector<2x1024xf32>
    %13 = vector.shape_cast %12 : vector<2x1024xf32> to vector<1x2x1024xf32>
    %cst_5 = arith.constant dense<0.000000e+00> : vector<1xf32>
    %14 = vector.multi_reduction <add>, %13, %cst_5 [1, 2] : vector<1x2x1024xf32> to vector<1xf32>
    %15 = vector.shape_cast %14 : vector<1xf32> to vector<1x1x1xf32>
    %16 = vector.extract %15[0, 0, 0] : f32 from vector<1x1x1xf32>
    %c0_6 = arith.constant 0 : index
    %c0_7 = arith.constant 0 : index
    %17 = memref.load %arg2[%c0_6, %c0_7] : memref<1x1xf32, #tpu.memory_space<smem>>
    memref.store %16, %arg2[%c0_6, %c0_7] : memref<1x1xf32, #tpu.memory_space<smem>>
    return
  }
}

</mosaic_0001>

<bundles_post_ra>
// kernel: tpu_custom_call.1
= control target key start
LH: loop header
LB: loop body
LE: loop exit
PB: predicated region body
PF: predicated region fallthrough
CT: control target
= control target key end

     0   :  { %7 = vsyncpa [#allocation3], 0  ;;  %s283_s0 = inlined_call_operand.hbm [shape: f32[2,1024], index: 0, kind: input, shape index: {}]   ;;  %s284_s1 = inlined_call_operand.hbm [shape: f32[2,1024], index: 1, kind: input, shape index: {}]   ;;  %s285_s2 = inlined_call_operand.hbm [shape: f32[1,1], index: 2, kind: output, shape index: {}]  }
   0x1   :  { %8 = vsyncpa [#allocation6], 0 }
   0x2   :  { %9 = vsyncpa [#allocation4], 0  ;;  %s220_s9 = smov [#allocation2]   ;;  %s221_s11 = smov [#allocation5]  }
   0x3   :  { %s16_s10 = sshll.u32 %s220_s9, 4  ;;  %s26_s12 = sshll.u32 %s221_s11, 4  ;;  %s17_s10 = int_to_ptr.vmem [resolvable:$true] %s16_s10  ;;  %s27_s12 = int_to_ptr.vmem [resolvable:$true] %s26_s12 }
   0x4   :  { %s160_s15 = scalar_lea.hbm %s283_s0, 256 }
   0x5   :  { %p161_p0 = scmp.ne.s32.totalorder %s283_s0, %s160_s15  ;;  %p164_p1 = scmp.lt.u32.totalorder %s160_s15, %s283_s0 }
   0x7   :  { %p166_p2 = pnand %p164_p1, %p161_p0 }
   0x9   :  { %169 = shalt.err (!%p166_p2)
}
   0xa   :  { %s170_s20 = scalar_lea.vmem %s17_s10, 256  ;;  %p175_p4 = scmp.lt.s32.totalorder %s17_s10, %s17_s10 }
   0xb   :  { %p171_p3 = scmp.ne.s32.totalorder %s17_s10, %s170_s20  ;;  %p176_p5 = scmp.lt.s32.totalorder %s170_s20, %s170_s20 }
   0xd   :  { %p177_p6 = por %p176_p5, %p175_p4 }
   0xf   :  { %p178_p7 = pnand %p177_p6, %p171_p3 }
  0x11   :  { %181 = shalt.err (!%p178_p7)
}
  0x12   :  { %19 = dma.hbm_to_vmem [thread:$0]  %s283_s0, 256, %s17_s10, [#allocation3]  }
  0x13   :  { %s182_s25 = scalar_lea.hbm %s284_s1, 256 }
  0x14   :  { %p183_p8 = scmp.ne.s32.totalorder %s284_s1, %s182_s25  ;;  %p186_p9 = scmp.lt.u32.totalorder %s182_s25, %s284_s1 }
  0x16   :  { %p188_p10 = pnand %p186_p9, %p183_p8 }
  0x18   :  { %191 = shalt.err (!%p188_p10)
}
  0x19   :  { %s192_s30 = scalar_lea.vmem %s27_s12, 256  ;;  %p197_p12 = scmp.lt.s32.totalorder %s27_s12, %s27_s12 }
  0x1a   :  { %p193_p11 = scmp.ne.s32.totalorder %s27_s12, %s192_s30  ;;  %p198_p13 = scmp.lt.s32.totalorder %s192_s30, %s192_s30 }
  0x1c   :  { %p199_p0 = por %p198_p13, %p197_p12 }
  0x1e   :  { %p200_p1 = pnand %p199_p0, %p193_p11 }
  0x20   :  { %203 = shalt.err (!%p200_p1)
}
  0x21   :  { %29 = dma.hbm_to_vmem [thread:$0]  %s284_s1, 256, %s27_s12, [#allocation6]  }
  0x22   :  { %214 = dma.done.wait [#allocation3], 256  }
  0x23   :  { %215 = vsyncadd [#allocation3], 4294967040 }
  0x24   :  { %216 = dma.done.wait [#allocation6], 256  }
  0x25   :  { %217 = vsyncadd [#allocation6], 4294967040  ;;  %v36_v0 = vld [vmem:[#allocation2] sm:$0xff]  ;;  %v37_v1 = vld [vmem:[#allocation2 + $0x8] sm:$0xff]  ;;  %v222_v8 = vmov 1983009808   ;;  %v66_v10 = vlaneseq }
  0x26   :  { %v40_v2 = vmax.f32 %v36_v0, 1e-06  ;;  %v41_v3 = vmax.f32 %v37_v1, 1e-06  ;;  %v64_v9 = vunpack.c.l.s4 %v222_v8  ;;  %v38_v20 = vld [vmem:[#allocation5] sm:$0xff]  ;;  %v39_v22 = vld [vmem:[#allocation5 + $0x8] sm:$0xff] }
  0x27   :  { %v67_v19 = vshrl.u32 %v66_v10, 7  ;;  %vm104_vm0 = vcmask 1041408   ;;  %s204_s6 = scalar_lea.hbm %s285_s2, 16 }
  0x28   :  { %v42_v4 = vmin.f32 %v40_v2, 0.999999  ;;  %v43_v5 = vmin.f32 %v41_v3, 0.999999  ;;  %v65_v18 = vunpack.c.0.s8 %v64_v9  ;;  %p205_p2 = scmp.ne.s32.totalorder %s285_s2, %s204_s6  ;;  %p208_p3 = scmp.lt.u32.totalorder %s204_s6, %s285_s2 }
  0x2a   :  { %v44_v6 = vsub.f32 1.0, %v42_v4  ;;  %v45_v7 = vsub.f32 1.0, %v43_v5  ;;  %152 = vlog2.f32 %v42_v4  ;;  %v68_v26 = vsub.s32 %v65_v18, %v67_v19  ;;  %p210_p4 = pnand %p208_p3, %p205_p2 }
  0x2b   :  { %154 = vlog2.f32 %v43_v5 }
  0x2c   :  { %156 = vlog2.f32 %v44_v6 }
  0x2d   :  { %158 = vlog2.f32 %v45_v7 }
  0x34   :  { %v153_v11 = vpop.eup %152 }
  0x35   :  { %v155_v12 = vpop.eup %154  ;;  %v51_v13 = vmul.f32 0.6931472, %v153_v11 }
  0x36   :  { %v157_v14 = vpop.eup %156  ;;  %v53_v15 = vmul.f32 0.6931472, %v155_v12 }
  0x37   :  { %v159_v16 = vpop.eup %158  ;;  %v47_v17 = vmul.f32 0.6931472, %v157_v14 }
  0x38   :  { %v49_v21 = vmul.f32 0.6931472, %v159_v16 }
  0x39   :  { %v54_v23 = vsub.f32 %v51_v13, %v47_v17 }
  0x3a   :  { %v55_v24 = vsub.f32 %v53_v15, %v49_v21 }
  0x3b   :  { %v56_v25 = vmul.f32 %v54_v23, %v38_v20 }
  0x3c   :  { %v57_v27 = vmul.f32 %v55_v24, %v39_v22 }
  0x3d   :  { %v58_v28 = vadd.f32 %v56_v25, %v47_v17 }
  0x3e   :  { %v59_v29 = vadd.f32 %v57_v27, %v49_v21 }
  0x3f   :  { %v62_v30 = vcombine.high %v58_v28, %v58_v28  ;;  %v69_v31 = vrot.slane %v58_v28, %v68_v26 }
  0x40   :  { %v79_v32 = vcombine.high %v59_v29, %v59_v29  ;;  %v86_v35 = vrot.slane %v59_v29, %v68_v26 }
  0x41   :  { %v76_v33 = vrot.slane %v62_v30, %v68_v26  ;;  %v77_v34 = vcombine.high %v69_v31, %v69_v31  ;;  %v105_v36 = vsel %vm104_vm0, %v69_v31, 0.0 }
  0x42   :  { %v93_v41 = vrot.slane %v79_v32, %v68_v26  ;;  %v94_v42 = vcombine.high %v86_v35, %v86_v35  ;;  %v112_v45 = vsel %vm104_vm0, %v86_v35, 0.0 }
  0x43   :  { %v78_v37 = vcombine.high %v76_v33, %v76_v33  ;;  %v106_v38 = vsel %vm104_vm0, %v77_v34, 0.0  ;;  %v108_v39 = vsel %vm104_vm0, %v76_v33, 0.0 }
  0x44   :  { %v107_v40 = vadd.f32 %v106_v38, %v105_v36  ;;  %v95_v47 = vcombine.high %v93_v41, %v93_v41  ;;  %v114_v48 = vsel %vm104_vm0, %v94_v42, 0.0  ;;  %v116_v50 = vsel %vm104_vm0, %v93_v41, 0.0 }
  0x45   :  { %v110_v43 = vsel %vm104_vm0, %v78_v37, 0.0 }
  0x46   :  { %v109_v44 = vadd.f32 %v108_v39, %v107_v40  ;;  %v118_v52 = vsel %vm104_vm0, %v95_v47, 0.0 }
  0x48   :  { %v111_v46 = vadd.f32 %v110_v43, %v109_v44 }
  0x4a   :  { %v113_v49 = vadd.f32 %v112_v45, %v111_v46 }
  0x4c   :  { %v115_v51 = vadd.f32 %v114_v48, %v113_v49 }
  0x4e   :  { %v117_v53 = vadd.f32 %v116_v50, %v115_v51 }
  0x50   :  { %v119_v54 = vadd.f32 %v118_v52, %v117_v53 }
  0x52   :  { %120 = vadd.xlane.f32.xlu0 %v119_v54 }
  0xdf   :  { %v121_v55 = vpop.xlane.xlu0 %120 }
  0xe0   :  { %v122_v56 = vrot.slane %v121_v55, 4 }
  0xe2   :  { %v123_v57 = vadd.f32 %v122_v56, %v121_v55 }
  0xe4   :  { %v124_v58 = vrot.slane %v123_v57, 2 }
  0xe6   :  { %v125_v59 = vadd.f32 %v124_v58, %v123_v57 }
  0xe8   :  { %v126_v60 = vrot.slane %v125_v59, 1 }
  0xea   :  { %v127_v61 = vadd.f32 %v126_v60, %v125_v59 }
  0xec   :  { %146 = vpush %v127_v61 }
 0x11d   :  { %s147_s1 = spop %146 }
 0x11e   :  { %130 = sst [smem:[#allocation7]] %s147_s1 }
 0x11f   :  { %213 = shalt.err (!%p210_p4)
}
 0x120   :  { %s223_s11 = smov [#allocation7]  }
 0x121   :  { %138 = dma.smem_to_hbm %s223_s11, 16, %s285_s2, [#allocation4]  }
 0x122   :  { %218 = dma.done.wait [#allocation4], 16  }
 0x123   :  { %219 = vsyncadd [#allocation4], 4294967280 }
 0x124   :  { %142 = sfence }
 0x125   :  { %143 = vsyncpa [#allocation3], 1 }
 0x126   :  { %144 = vsyncpa [#allocation6], 1 }
 0x127   :  { %145 = vsyncpa [#allocation4], 1 }

</bundles_post_ra>
